<compile_context>
chip_gen: v6e
topology: v6e:2x2x1
jax: 0.10.0
libtpu: 0.0.40
codegen_flags: <defaults>
</compile_context>

<pallas_src>
import jax
import jax.numpy as jnp
from jax.experimental import pallas as pl
from jax.experimental.pallas import tpu as pltpu


def decoder_mlp_kernel(x_ref, w1_ref, b1_ref, w2_ref, b2_ref,
                       logits_ref, lse_ref, h_ref, m_ref, l_ref):
    j = pl.program_id(1)
    nv = pl.num_programs(1)

    @pl.when(j == 0)
    def _init():
        # Hidden layer once per batch tile: bf16 x bf16 -> f32 accumulate.
        h = jnp.dot(x_ref[...], w1_ref[...], preferred_element_type=jnp.float32)
        h = jnp.maximum(h + b1_ref[...], 0.0)            # ReLU in f32
        h_ref[...] = h.astype(h_ref.dtype)               # bf16 for second MXU pass
        m_ref[...] = jnp.full_like(m_ref, -jnp.inf)      # running max
        l_ref[...] = jnp.zeros_like(l_ref)               # running sum of exp

    # Output-layer slice: (TB, H) @ (H, TILE_V) + (1, TILE_V), f32 accumulate.
    logits = jnp.dot(h_ref[...], w2_ref[...], preferred_element_type=jnp.float32)
    logits = logits + b2_ref[...]

    # Streamed, lane-dense (TB, TILE_V) writeback — pipelined per v-tile.
    logits_ref[...] = logits

    # Online logsumexp update (all in f32).
    m_prev = m_ref[...]
    m_new = jnp.maximum(m_prev, jnp.max(logits, axis=-1, keepdims=True))
    l_ref[...] = (l_ref[...] * jnp.exp(m_prev - m_new)
                  + jnp.sum(jnp.exp(logits - m_new), axis=-1, keepdims=True))
    m_ref[...] = m_new

    @pl.when(j == nv - 1)
    def _finalize():
        lse_ref[...] = m_ref[...] + jnp.log(l_ref[...])


def _default_tile_b(B):
    if B <= 256:
        return B
    for tb in (256, 128, 64, 32, 16, 8):
        if B % tb == 0:
            return tb
    return B


def _default_tile_v(V):
    # Prefer large lane-dense V tiles (>= ~1 MiB of W2 per step at H=256).
    if V <= 4096:
        return V
    for tv in (4096, 2048, 1024, 512, 256, 128):
        if V % tv == 0:
            return tv
    return V  # fall back to a single full-V tile


def _vmem_limit_bytes():
    phys = None
    try:
        info = pltpu.get_tpu_info()
        phys = getattr(info, "vmem_capacity_bytes", None)
    except Exception:
        phys = None
    if not phys:
        phys = 64 * 1024 * 1024          # conservative: v7x physical VMEM
    # 3/4 of physical, capped at 100 MiB (v5e/v6e have 128 MiB physical).
    return min((phys * 3) // 4, 100 * 1024 * 1024)


def decoder_mlp(x, w1, b1, w2, b2, *, tile_b=None, tile_v=None):
    """Fused MLP + log_softmax.

    x:  (B, D_in)  bfloat16 (or f32) — batch-major, feature on lane axis.
    w1: (D_in, H)  bfloat16   b1: (1, H)  float32
    w2: (H, V)     bfloat16   b2: (1, V)  float32
    returns (B, V) float32 log-probabilities (log_softmax over dim=1).
    """
    B, D_in = x.shape
    H = w1.shape[1]
    V = w2.shape[1]
    tile_b = _default_tile_b(B) if tile_b is None else tile_b
    tile_v = _default_tile_v(V) if tile_v is None else tile_v
    assert B % tile_b == 0, "B must be divisible by tile_b"
    assert V % tile_v == 0, "tile_v must divide V"
    assert tile_v == V or tile_v % 128 == 0, "tile_v must be lane-dense"
    grid = (B // tile_b, V // tile_v)

    logits, lse = pl.pallas_call(
        decoder_mlp_kernel,
        out_shape=(
            jax.ShapeDtypeStruct((B, V), jnp.float32),   # raw logits (streamed)
            jax.ShapeDtypeStruct((B, 1), jnp.float32),   # logsumexp per row
        ),
        grid_spec=pltpu.PrefetchScalarGridSpec(
            num_scalar_prefetch=0,
            grid=grid,
            in_specs=[
                pl.BlockSpec((tile_b, D_in), lambda i, j: (i, 0)),   # x
                pl.BlockSpec((D_in, H), lambda i, j: (0, 0)),        # W1 (constant block)
                pl.BlockSpec((1, H), lambda i, j: (0, 0)),           # b1
                pl.BlockSpec((H, tile_v), lambda i, j: (0, j)),      # W2 slice
                pl.BlockSpec((1, tile_v), lambda i, j: (0, j)),      # b2 slice
            ],
            out_specs=(
                pl.BlockSpec((tile_b, tile_v), lambda i, j: (i, j)),  # logits slice
                pl.BlockSpec((tile_b, 1), lambda i, j: (i, 0)),       # lse (resident over V)
            ),
            scratch_shapes=[
                pltpu.VMEM((tile_b, H), jnp.bfloat16),   # hidden activations
                pltpu.VMEM((tile_b, 1), jnp.float32),    # running max
                pltpu.VMEM((tile_b, 1), jnp.float32),    # running sum
            ],
        ),
        compiler_params=pltpu.CompilerParams(
            dimension_semantics=("parallel", "arbitrary"),
            vmem_limit_bytes=_vmem_limit_bytes(),
        ),
    )(x, w1, b1, w2, b2)

    # log_softmax = logits - logsumexp; single fused XLA broadcast-subtract.
    return logits - lse


def init_params(key, input_size, hidden_size, output_size):
    """Deterministic init mimicking nn.Linear (uniform +/- 1/sqrt(fan_in))."""
    k1, k2, k3, k4 = jax.random.split(key, 4)
    bnd1 = 1.0 / jnp.sqrt(input_size)
    bnd2 = 1.0 / jnp.sqrt(hidden_size)
    # Stored as [in, out] (transposed relative to PyTorch's [out, in]).
    w1 = jax.random.uniform(k1, (input_size, hidden_size), jnp.float32, -bnd1, bnd1)
    b1 = jax.random.uniform(k2, (1, hidden_size), jnp.float32, -bnd1, bnd1)
    w2 = jax.random.uniform(k3, (hidden_size, output_size), jnp.float32, -bnd2, bnd2)
    b2 = jax.random.uniform(k4, (1, output_size), jnp.float32, -bnd2, bnd2)
    return w1, b1, w2, b2


if __name__ == "__main__":
    # Small shapes consistent with the module defaults.
    B = 8
    INPUT_SIZE = 128
    HIDDEN_SIZE = 256
    OUTPUT_SIZE = 1024

    key = jax.random.PRNGKey(0)
    kx, kp = jax.random.split(key)
    x = jax.random.normal(kx, (B, INPUT_SIZE), jnp.float32)
    w1, b1, w2, b2 = init_params(kp, INPUT_SIZE, HIDDEN_SIZE, OUTPUT_SIZE)

    # Matmul inputs in bf16 (halves weight DMA bytes; native MXU format).
    xb = x.astype(jnp.bfloat16)
    w1b = w1.astype(jnp.bfloat16)
    w2b = w2.astype(jnp.bfloat16)

    # Plain-JAX f32 reference using the same bf16-rounded matmul inputs.
    f32 = jnp.float32
    hi = jnp.dot(xb.astype(f32), w1b.astype(f32),
                 precision=jax.lax.Precision.HIGHEST) + b1
    h_q = jnp.maximum(hi, 0.0).astype(jnp.bfloat16).astype(f32)
    logits_ref = jnp.dot(h_q, w2b.astype(f32),
                         precision=jax.lax.Precision.HIGHEST) + b2
    ref = jax.nn.log_softmax(logits_ref, axis=1)

    # 1) Default tiling: V<=4096 -> single lane-dense V tile.
    out = jax.block_until_ready(decoder_mlp(xb, w1b, b1, w2b, b2))
    assert out.shape == (B, OUTPUT_SIZE)
    err = float(jnp.max(jnp.abs(out - ref)))
    assert jnp.allclose(out, ref, atol=1e-3, rtol=1e-3), f"max_err(default)={err}"

    # 2) Multi-V-tile path: exercises streamed output + online logsumexp.
    out_t = jax.block_until_ready(decoder_mlp(xb, w1b, b1, w2b, b2, tile_v=256))
    err_t = float(jnp.max(jnp.abs(out_t - ref)))
    assert jnp.allclose(out_t, ref, atol=1e-3, rtol=1e-3), f"max_err(tiled)={err_t}"

    print("KERNEL_OK")
</pallas_src>

<mosaic_0001>
module attributes {stable_mosaic.version = 11 : i64} {
  func.func @decoder_mlp_kernel(%arg0: i32, %arg1: i32, %arg2: memref<8x128xbf16, #tpu.memory_space<vmem>>, %arg3: memref<128x256xbf16, #tpu.memory_space<vmem>>, %arg4: memref<1x256xf32, #tpu.memory_space<vmem>>, %arg5: memref<256x1024xbf16, #tpu.memory_space<vmem>>, %arg6: memref<1x1024xf32, #tpu.memory_space<vmem>>, %arg7: memref<8x1024xf32, #tpu.memory_space<vmem>>, %arg8: memref<8x1xf32, #tpu.memory_space<vmem>>, %arg9: memref<8x256xbf16, #tpu.memory_space<vmem>>, %arg10: memref<8x1xf32, #tpu.memory_space<vmem>>, %arg11: memref<8x1xf32, #tpu.memory_space<vmem>>) attributes {dimension_semantics = [#tpu.dimension_semantics<parallel>, #tpu.dimension_semantics<arbitrary>], iteration_bounds = array<i64: 1, 1>, scalar_prefetch = 0 : i64, scratch_operands = 3 : i64, tpu.core_type = #tpu.core_type<tc>, window_params = [{transform_indices = @transform_0, window_bounds = array<i64: 8, 128>}, {pipeline_mode = #tpu.pipeline_mode<synchronous>, transform_indices = @transform_1, window_bounds = array<i64: 128, 256>}, {pipeline_mode = #tpu.pipeline_mode<synchronous>, transform_indices = @transform_2, window_bounds = array<i64: 1, 256>}, {transform_indices = @transform_3, window_bounds = array<i64: 256, 1024>}, {transform_indices = @transform_4, window_bounds = array<i64: 1, 1024>}, {transform_indices = @transform_5, window_bounds = array<i64: 8, 1024>}, {transform_indices = @transform_6, window_bounds = array<i64: 8, 1>}]} {
    %c0_i32 = arith.constant 0 : i32
    %0 = arith.cmpi eq, %arg1, %c0_i32 : i32
    %1 = arith.extui %0 : i1 to i32
    %c0_i32_0 = arith.constant 0 : i32
    %2 = arith.cmpi ne, %1, %c0_i32_0 : i32
    scf.if %2 {
      %c0_20 = arith.constant 0 : index
      %c0_21 = arith.constant 0 : index
      %29 = vector.load %arg2[%c0_20, %c0_21] : memref<8x128xbf16, #tpu.memory_space<vmem>>, vector<8x128xbf16>
      %c0_22 = arith.constant 0 : index
      %c0_23 = arith.constant 0 : index
      %30 = vector.load %arg3[%c0_22, %c0_23] : memref<128x256xbf16, #tpu.memory_space<vmem>>, vector<128x256xbf16>
      %cst_24 = arith.constant dense<0.000000e+00> : vector<8x256xf32>
      %31 = tpu.matmul %29, %30, %cst_24 {dimension_numbers = #tpu.dot_dimension_numbers<[1], [0], [0], [1], [0, 0, 1, 1], [], []>} : vector<8x128xbf16>, vector<128x256xbf16>, vector<8x256xf32> -> vector<8x256xf32>
      %c0_25 = arith.constant 0 : index
      %c0_26 = arith.constant 0 : index
      %32 = vector.load %arg4[%c0_25, %c0_26] : memref<1x256xf32, #tpu.memory_space<vmem>>, vector<1x256xf32>
      %33 = vector.broadcast %32 : vector<1x256xf32> to vector<8x256xf32>
      %34 = arith.addf %31, %33 : vector<8x256xf32>
      %cst_27 = arith.constant 0.000000e+00 : f32
      %35 = vector.broadcast %cst_27 : f32 to vector<8x256xf32>
      %36 = arith.maximumf %34, %35 : vector<8x256xf32>
      %37 = arith.truncf %36 : vector<8x256xf32> to vector<8x256xbf16>
      %c0_28 = arith.constant 0 : index
      %c0_29 = arith.constant 0 : index
      %38 = vector.load %arg9[%c0_28, %c0_29] : memref<8x256xbf16, #tpu.memory_space<vmem>>, vector<8x256xbf16>
      tpu.vector_store %arg9[%c0_28, %c0_29], %37 {strides = array<i32>} : memref<8x256xbf16, #tpu.memory_space<vmem>>, vector<8x256xbf16>,
      %cst_30 = arith.constant 0xFF800000 : f32
      %39 = vector.broadcast %cst_30 : f32 to vector<8x1xf32>
      %c0_31 = arith.constant 0 : index
      %c0_32 = arith.constant 0 : index
      %40 = vector.load %arg10[%c0_31, %c0_32] : memref<8x1xf32, #tpu.memory_space<vmem>>, vector<8x1xf32>
      tpu.vector_store %arg10[%c0_31, %c0_32], %39 {strides = array<i32>} : memref<8x1xf32, #tpu.memory_space<vmem>>, vector<8x1xf32>,
      %cst_33 = arith.constant 0.000000e+00 : f32
      %41 = vector.broadcast %cst_33 : f32 to vector<8x1xf32>
      %c0_34 = arith.constant 0 : index
      %c0_35 = arith.constant 0 : index
      %42 = vector.load %arg11[%c0_34, %c0_35] : memref<8x1xf32, #tpu.memory_space<vmem>>, vector<8x1xf32>
      tpu.vector_store %arg11[%c0_34, %c0_35], %41 {strides = array<i32>} : memref<8x1xf32, #tpu.memory_space<vmem>>, vector<8x1xf32>,
    } else {
    }
    %c0 = arith.constant 0 : index
    %c0_1 = arith.constant 0 : index
    %3 = vector.load %arg9[%c0, %c0_1] : memref<8x256xbf16, #tpu.memory_space<vmem>>, vector<8x256xbf16>
    %c0_2 = arith.constant 0 : index
    %c0_3 = arith.constant 0 : index
    %4 = vector.load %arg5[%c0_2, %c0_3] : memref<256x1024xbf16, #tpu.memory_space<vmem>>, vector<256x1024xbf16>
    %cst = arith.constant dense<0.000000e+00> : vector<8x1024xf32>
    %5 = tpu.matmul %3, %4, %cst {dimension_numbers = #tpu.dot_dimension_numbers<[1], [0], [0], [1], [0, 0, 1, 1], [], []>} : vector<8x256xbf16>, vector<256x1024xbf16>, vector<8x1024xf32> -> vector<8x1024xf32>
    %c0_4 = arith.constant 0 : index
    %c0_5 = arith.constant 0 : index
    %6 = vector.load %arg6[%c0_4, %c0_5] : memref<1x1024xf32, #tpu.memory_space<vmem>>, vector<1x1024xf32>
    %7 = vector.broadcast %6 : vector<1x1024xf32> to vector<8x1024xf32>
    %8 = arith.addf %5, %7 : vector<8x1024xf32>
    %c0_6 = arith.constant 0 : index
    %c0_7 = arith.constant 0 : index
    %9 = vector.load %arg7[%c0_6, %c0_7] : memref<8x1024xf32, #tpu.memory_space<vmem>>, vector<8x1024xf32>
    tpu.vector_store %arg7[%c0_6, %c0_7], %8 {strides = array<i32>} : memref<8x1024xf32, #tpu.memory_space<vmem>>, vector<8x1024xf32>,
    %c0_8 = arith.constant 0 : index
    %c0_9 = arith.constant 0 : index
    %10 = vector.load %arg10[%c0_8, %c0_9] : memref<8x1xf32, #tpu.memory_space<vmem>>, vector<8x1xf32>
    %cst_10 = arith.constant dense<0xFF800000> : vector<8xf32>
    %11 = vector.multi_reduction <maximumf>, %8, %cst_10 [1] : vector<8x1024xf32> to vector<8xf32>
    %12 = vector.shape_cast %11 : vector<8xf32> to vector<8x1xf32>
    %13 = arith.maximumf %10, %12 : vector<8x1xf32>
    %c0_11 = arith.constant 0 : index
    %c0_12 = arith.constant 0 : index
    %14 = vector.load %arg11[%c0_11, %c0_12] : memref<8x1xf32, #tpu.memory_space<vmem>>, vector<8x1xf32>
    %15 = arith.subf %10, %13 : vector<8x1xf32>
    %16 = math.exp %15 : vector<8x1xf32>
    %17 = arith.mulf %14, %16 : vector<8x1xf32>
    %18 = vector.broadcast %13 : vector<8x1xf32> to vector<8x1024xf32>
    %19 = arith.subf %8, %18 : vector<8x1024xf32>
    %20 = math.exp %19 : vector<8x1024xf32>
    %cst_13 = arith.constant dense<0.000000e+00> : vector<8xf32>
    %21 = vector.multi_reduction <add>, %20, %cst_13 [1] : vector<8x1024xf32> to vector<8xf32>
    %22 = vector.shape_cast %21 : vector<8xf32> to vector<8x1xf32>
    %23 = arith.addf %17, %22 : vector<8x1xf32>
    %c0_14 = arith.constant 0 : index
    %c0_15 = arith.constant 0 : index
    %24 = vector.load %arg11[%c0_14, %c0_15] : memref<8x1xf32, #tpu.memory_space<vmem>>, vector<8x1xf32>
    tpu.vector_store %arg11[%c0_14, %c0_15], %23 {strides = array<i32>} : memref<8x1xf32, #tpu.memory_space<vmem>>, vector<8x1xf32>,
    %c0_16 = arith.constant 0 : index
    %c0_17 = arith.constant 0 : index
    %25 = vector.load %arg10[%c0_16, %c0_17] : memref<8x1xf32, #tpu.memory_space<vmem>>, vector<8x1xf32>
    tpu.vector_store %arg10[%c0_16, %c0_17], %13 {strides = array<i32>} : memref<8x1xf32, #tpu.memory_space<vmem>>, vector<8x1xf32>,
    %c0_i32_18 = arith.constant 0 : i32
    %26 = arith.cmpi eq, %arg1, %c0_i32_18 : i32
    %27 = arith.extui %26 : i1 to i32
    %c0_i32_19 = arith.constant 0 : i32
    %28 = arith.cmpi ne, %27, %c0_i32_19 : i32
    scf.if %28 {
      %c0_20 = arith.constant 0 : index
      %c0_21 = arith.constant 0 : index
      %29 = vector.load %arg10[%c0_20, %c0_21] : memref<8x1xf32, #tpu.memory_space<vmem>>, vector<8x1xf32>
      %c0_22 = arith.constant 0 : index
      %c0_23 = arith.constant 0 : index
      %30 = vector.load %arg11[%c0_22, %c0_23] : memref<8x1xf32, #tpu.memory_space<vmem>>, vector<8x1xf32>
      %31 = math.log %30 : vector<8x1xf32>
      %32 = arith.addf %29, %31 : vector<8x1xf32>
      %c0_24 = arith.constant 0 : index
      %c0_25 = arith.constant 0 : index
      %33 = vector.load %arg8[%c0_24, %c0_25] : memref<8x1xf32, #tpu.memory_space<vmem>>, vector<8x1xf32>
      tpu.vector_store %arg8[%c0_24, %c0_25], %32 {strides = array<i32>} : memref<8x1xf32, #tpu.memory_space<vmem>>, vector<8x1xf32>,
    } else {
    }
    return
  }
  func.func @transform_0(%arg0: i32, %arg1: i32) -> (i32, i32) {
    %c0_i32 = arith.constant 0 : i32
    %c0_i32_0 = arith.constant 0 : i32
    return %arg0, %c0_i32 : i32, i32
  }
  func.func @transform_1(%arg0: i32, %arg1: i32) -> (i32, i32) {
    %c0_i32 = arith.constant 0 : i32
    %c0_i32_0 = arith.constant 0 : i32
    %c0_i32_1 = arith.constant 0 : i32
    return %c0_i32, %c0_i32_0 : i32, i32
  }
  func.func @transform_2(%arg0: i32, %arg1: i32) -> (i32, i32) {
    %c0_i32 = arith.constant 0 : i32
    %c0_i32_0 = arith.constant 0 : i32
    %c0_i32_1 = arith.constant 0 : i32
    return %c0_i32, %c0_i32_0 : i32, i32
  }
  func.func @transform_3(%arg0: i32, %arg1: i32) -> (i32, i32) {
    %c0_i32 = arith.constant 0 : i32
    %c0_i32_0 = arith.constant 0 : i32
    return %c0_i32, %arg1 : i32, i32
  }
  func.func @transform_4(%arg0: i32, %arg1: i32) -> (i32, i32) {
    %c0_i32 = arith.constant 0 : i32
    %c0_i32_0 = arith.constant 0 : i32
    return %c0_i32, %arg1 : i32, i32
  }
  func.func @transform_5(%arg0: i32, %arg1: i32) -> (i32, i32) {
    %c0_i32 = arith.constant 0 : i32
    return %arg0, %arg1 : i32, i32
  }
  func.func @transform_6(%arg0: i32, %arg1: i32) -> (i32, i32) {
    %c0_i32 = arith.constant 0 : i32
    %c0_i32_0 = arith.constant 0 : i32
    return %arg0, %c0_i32 : i32, i32
  }
}

</mosaic_0001>

<bundles_post_ra>
// kernel: tpu_custom_call.1
= control target key start
LH: loop header
LB: loop body
LE: loop exit
PB: predicated region body
PF: predicated region fallthrough
CT: control target
= control target key end

     0   :  { %12 = vsyncpa [#allocation6], 0  ;;  %s1733_s0 = inlined_call_operand.hbm [shape: bf16[8,128], index: 0, kind: input, shape index: {}]   ;;  %s1734_s1 = inlined_call_operand.hbm [shape: bf16[128,256], index: 1, kind: input, shape index: {}]   ;;  %s1735_s2 = inlined_call_operand.vmem [shape: f32[1,256], index: 2, kind: input, shape index: {}]   ;;  %s1736_s3 = inlined_call_operand.hbm [shape: bf16[256,1024], index: 3, kind: input, shape index: {}]   ;;  %s1737_s4 = inlined_call_operand.hbm [shape: f32[1,1024], index: 4, kind: input, shape index: {}]   ;;  %s1738_s5 = inlined_call_operand.hbm [shape: f32[8,1024], index: 5, kind: output, shape index: {0}]   ;;  %s1739_s6 = inlined_call_operand.vmem [shape: f32[8,1], index: 6, kind: output, shape index: {1}]  }
   0x1   :  { %13 = vsyncpa [#allocation9], 0 }
   0x2   :  { %14 = vsyncpa [#allocation12], 0 }
   0x3   :  { %15 = vsyncpa [#allocation7], 0  ;;  %s1636_s21 = smov [#allocation8]  }
   0x4   :  { %s31_s22 = sshll.u32 %s1636_s21, 4  ;;  %s32_s22 = int_to_ptr.vmem [resolvable:$true] %s31_s22 }
   0x5   :  { %s1536_s23 = scalar_lea.vmem %s32_s22, 2048  ;;  %p1541_p1 = scmp.lt.s32.totalorder %s32_s22, %s32_s22 }
   0x6   :  { %p1537_p0 = scmp.ne.s32.totalorder %s32_s22, %s1536_s23  ;;  %p1542_p2 = scmp.lt.s32.totalorder %s1536_s23, %s1536_s23 }
   0x8   :  { %p1543_p3 = por %p1542_p2, %p1541_p1 }
   0xa   :  { %p1544_p4 = pnand %p1543_p3, %p1537_p0 }
   0xc   :  { %1547 = shalt.err (!%p1544_p4)
}
   0xd   :  { %s1637_s24 = smov 128   ;;  %s1638_s25 = smov 8  }
   0xe   :  { %37 = dma.hbm_to_vmem [thread:$0]  %s1734_s1, 2048, %s32_s22, [#allocation9], %s1637_s24, %s1637_s24, %s1638_s25  }
   0xf   :  { %s1639_s28 = smov [#allocation5]   ;;  %s1640_s30 = smov [#allocation10]  }
  0x10   :  { %s22_s29 = sshll.u32 %s1639_s28, 4  ;;  %s45_s7 = sshll.u32 %s1640_s30, 4  ;;  %s23_s29 = int_to_ptr.vmem [resolvable:$true] %s22_s29  ;;  %s46_s7 = int_to_ptr.vmem [resolvable:$true] %s45_s7 }
  0x11   :  { %s1556_s8 = scalar_lea.vmem %s23_s29, 64  ;;  %p1561_p6 = scmp.lt.s32.totalorder %s23_s29, %s23_s29 }
  0x12   :  { %p1557_p5 = scmp.ne.s32.totalorder %s23_s29, %s1556_s8  ;;  %p1562_p7 = scmp.lt.s32.totalorder %s1556_s8, %s1556_s8 }
  0x14   :  { %p1563_p8 = por %p1562_p7, %p1561_p6 }
  0x16   :  { %p1564_p9 = pnand %p1563_p8, %p1557_p5 }
  0x18   :  { %1567 = shalt.err (!%p1564_p9)
}
  0x19   :  { %25 = dma.hbm_to_vmem [thread:$0]  %s1733_s0, 64, %s23_s29, [#allocation6]  }
  0x1a   :  { %s1576_s11 = scalar_lea.vmem %s46_s7, 16384  ;;  %p1581_p11 = scmp.lt.s32.totalorder %s46_s7, %s46_s7 }
  0x1b   :  { %p1577_p10 = scmp.ne.s32.totalorder %s46_s7, %s1576_s11  ;;  %p1582_p12 = scmp.lt.s32.totalorder %s1576_s11, %s1576_s11 }
  0x1d   :  { %p1583_p13 = por %p1582_p12, %p1581_p11 }
  0x1f   :  { %p1584_p0 = pnand %p1583_p13, %p1577_p10 }
  0x21   :  { %1587 = shalt.err (!%p1584_p0)
}
  0x22   :  { %s1641_s1 = smov 512   ;;  %s1642_s12 = smov 32  }
  0x23   :  { %51 = dma.hbm_to_vmem [thread:$0]  %s1736_s3, 16384, %s46_s7, [#allocation9], %s1641_s1, %s1641_s1, %s1642_s12  }
  0x24   :  { %s1643_s15 = smov [#allocation11]  }
  0x25   :  { %s58_s16 = sshll.u32 %s1643_s15, 4  ;;  %s59_s16 = int_to_ptr.vmem [resolvable:$true] %s58_s16 }
  0x26   :  { %s1596_s17 = scalar_lea.vmem %s59_s16, 128  ;;  %p1601_p2 = scmp.lt.s32.totalorder %s59_s16, %s59_s16 }
  0x27   :  { %p1597_p1 = scmp.ne.s32.totalorder %s59_s16, %s1596_s17  ;;  %p1602_p3 = scmp.lt.s32.totalorder %s1596_s17, %s1596_s17 }
  0x29   :  { %p1603_p4 = por %p1602_p3, %p1601_p2 }
  0x2b   :  { %p1604_p5 = pnand %p1603_p4, %p1597_p1 }
  0x2d   :  { %1607 = shalt.err (!%p1604_p5)
}
  0x2e   :  { %61 = dma.hbm_to_vmem [thread:$0]  %s1737_s4, 128, %s59_s16, [#allocation12]  }
  0x2f   :  { %1628 = dma.done.wait [#allocation6], 64  }
  0x30   :  { %1629 = vsyncadd [#allocation6], 4294967232 }
  0x31   :  { %1630 = dma.done.wait [#allocation9], 18432  }
  0x32   :  { %1631 = vsyncadd [#allocation9], 4294948864 }
  0x33   :  { %1632 = dma.done.wait [#allocation12], 128  }
  0x34   :  { %1633 = vsyncadd [#allocation12], 4294967168  ;;  %v1644_v0 = vmov 0   ;;  %v1484_v1 = vld [vmem:[#allocation8 + $0x74] ss:$8 sps:$4 sm:$0xff]   ;;  %v300_v9 = vld [vmem:[#allocation10 + $0x1c0] sm:$0xff] }
  0x35   :  { %220 = vmatprep.mubr.bf16.mxu0 %v1644_v0  ;;  %1483 = vset.pattern.permute.xlu0 %v1644_v0  ;;  %v1486_v2 = vld [vmem:[#allocation8 + $0x70] ss:$8 sps:$4 sm:$0xff]   ;;  %v1487_v3 = vld [vmem:[#allocation8 + $0x64] ss:$8 sps:$4 sm:$0xff]   ;;  %v1489_v4 = vld [vmem:[#allocation8 + $0x60] ss:$8 sps:$4 sm:$0xff]  }
  0x36   :  { %188 = vmatprep.subr.bf16.mxu0 %v1484_v1  ;;  %v1490_v5 = vld [vmem:[#allocation8 + $0x54] ss:$8 sps:$4 sm:$0xff]   ;;  %v1492_v6 = vld [vmem:[#allocation8 + $0x50] ss:$8 sps:$4 sm:$0xff]   ;;  %v1493_v7 = vld [vmem:[#allocation8 + $0x44] ss:$8 sps:$4 sm:$0xff]  }
  0x37   :  { %189 = vmatpush1.bf16.msra.mxu0 %v1486_v2  ;;  %v1495_v8 = vld [vmem:[#allocation8 + $0x40] ss:$8 sps:$4 sm:$0xff]   ;;  %v1496_v11 = vld [vmem:[#allocation8 + $0x34] ss:$8 sps:$4 sm:$0xff]   ;;  %v1498_v19 = vld [vmem:[#allocation8 + $0x30] ss:$8 sps:$4 sm:$0xff]  }
  0x38   :  { %190 = vmatprep.subr.bf16.mxu0 %v1487_v3  ;;  %v304_v10 = vld [vmem:[#allocation10 + $0x1e0] sm:$0xff]  ;;  %v1502_v27 = vld [vmem:[#allocation8 + $0x14] ss:$8 sps:$4 sm:$0xff]   ;;  %v1504_v31 = vld [vmem:[#allocation8 + $0x10] ss:$8 sps:$4 sm:$0xff]   ;;  %vm240_vm0 = vcmask 7168  }
  0x39   :  { %v1397_v12 = vcombine.high %v300_v9, %v304_v10  ;;  %v1396_v13 = vcombine.low %v300_v9, %v304_v10  ;;  %v292_v14 = vld [vmem:[#allocation10 + $0x180] sm:$0xff]  ;;  %v301_v34 = vld [vmem:[#allocation10 + $0x1c8] sm:$0xff]  ;;  %v79_v47 = vld [vmem:[#allocation5] sm:$0xf] }
  0x3a   :  { %v296_v15 = vld [vmem:[#allocation10 + $0x1a0] sm:$0xff]  ;;  %v305_v36 = vld [vmem:[#allocation10 + $0x1e8] sm:$0xff] }
  0x3b   :  { %191 = vmatpush1.bf16.msra.mxu0 %v1489_v4  ;;  %v1389_v16 = vcombine.high %v292_v14, %v296_v15  ;;  %v284_v17 = vld [vmem:[#allocation10 + $0x140] sm:$0xff]  ;;  %1061 = vmatprep.subr.bf16.mxu1 %v1397_v12  ;;  %v1388_v20 = vcombine.low %v292_v14, %v296_v15  ;;  %v1399_v41 = vcombine.high %v301_v34, %v305_v36  ;;  %v293_v42 = vld [vmem:[#allocation10 + $0x188] sm:$0xff] }
  0x3c   :  { %192 = vmatprep.subr.bf16.mxu0 %v1490_v5  ;;  %v288_v18 = vld [vmem:[#allocation10 + $0x160] sm:$0xff]  ;;  %1062 = vmatpush1.bf16.msra.mxu1 %v1396_v13  ;;  %v297_v44 = vld [vmem:[#allocation10 + $0x1a8] sm:$0xff]  ;;  %v1398_v48 = vcombine.low %v301_v34, %v305_v36 }
  0x3d   :  { %v1499_v21 = vld [vmem:[#allocation8 + $0x24] ss:$8 sps:$4 sm:$0xff]   ;;  %1063 = vmatprep.subr.bf16.mxu1 %v1389_v16  ;;  %v1381_v22 = vcombine.high %v284_v17, %v288_v18  ;;  %v1501_v25 = vld [vmem:[#allocation8 + $0x20] ss:$8 sps:$4 sm:$0xff]   ;;  %v1380_v26 = vcombine.low %v284_v17, %v288_v18  ;;  %v1391_v50 = vcombine.high %v293_v42, %v297_v44  ;;  %v1390_v56 = vcombine.low %v293_v42, %v297_v44 }
  0x3e   :  { %v276_v23 = vld [vmem:[#allocation10 + $0x100] sm:$0xff]  ;;  %v285_v51 = vld [vmem:[#allocation10 + $0x148] sm:$0xff] }
  0x3f   :  { %193 = vmatpush1.bf16.msra.mxu0 %v1492_v6  ;;  %v280_v24 = vld [vmem:[#allocation10 + $0x120] sm:$0xff]  ;;  %v289_v53 = vld [vmem:[#allocation10 + $0x168] sm:$0xff] }
  0x40   :  { %194 = vmatprep.subr.bf16.mxu0 %v1493_v7  ;;  %1064 = vmatpush1.bf16.msra.mxu1 %v1388_v20  ;;  %v1373_v28 = vcombine.high %v276_v23, %v280_v24  ;;  %v268_v29 = vld [vmem:[#allocation10 + $0xc0] sm:$0xff]  ;;  %v1372_v32 = vcombine.low %v276_v23, %v280_v24  ;;  %v1383_v58 = vcombine.high %v285_v51, %v289_v53  ;;  %v277_v59 = vld [vmem:[#allocation10 + $0x108] sm:$0xff] }
  0x41   :  { %1065 = vmatprep.subr.bf16.mxu1 %v1381_v22  ;;  %v272_v30 = vld [vmem:[#allocation10 + $0xe0] sm:$0xff]  ;;  %v281_v61 = vld [vmem:[#allocation10 + $0x128] sm:$0xff]  ;;  %v1382_v0 = vcombine.low %v285_v51, %v289_v53 }
  0x42   :  { %v1505_v33 = vld [vmem:[#allocation8 + $0x4] ss:$8 sps:$4 sm:$0xff]   ;;  %v1365_v35 = vcombine.high %v268_v29, %v272_v30  ;;  %v1507_v39 = vld [vmem:[#allocation8] ss:$8 sps:$4 sm:$0xff]   ;;  %v1364_v40 = vcombine.low %v268_v29, %v272_v30  ;;  %v1375_v2 = vcombine.high %v277_v59, %v281_v61 }
  0x43   :  { %195 = vmatpush1.bf16.msra.mxu0 %v1495_v8  ;;  %v260_v37 = vld [vmem:[#allocation10 + $0x80] sm:$0xff]  ;;  %v269_v3 = vld [vmem:[#allocation10 + $0xc8] sm:$0xff]  ;;  %v1374_v8 = vcombine.low %v277_v59, %v281_v61 }
  0x44   :  { %196 = vmatprep.subr.bf16.mxu0 %v1496_v11  ;;  %1066 = vmatpush1.bf16.msra.mxu1 %v1380_v26  ;;  %v264_v38 = vld [vmem:[#allocation10 + $0xa0] sm:$0xff]  ;;  %v273_v5 = vld [vmem:[#allocation10 + $0xe8] sm:$0xff] }
  0x45   :  { %1067 = vmatprep.subr.bf16.mxu1 %v1373_v28  ;;  %v1357_v43 = vcombine.high %v260_v37, %v264_v38  ;;  %v252_v45 = vld [vmem:[#allocation10 + $0x40] sm:$0xff]  ;;  %v1356_v49 = vcombine.low %v260_v37, %v264_v38  ;;  %v1367_v10 = vcombine.high %v269_v3, %v273_v5  ;;  %v261_v11 = vld [vmem:[#allocation10 + $0x88] sm:$0xff]  ;;  %v1366_v16 = vcombine.low %v269_v3, %v273_v5 }
  0x46   :  { %v256_v46 = vld [vmem:[#allocation10 + $0x60] sm:$0xff]  ;;  %v265_v13 = vld [vmem:[#allocation10 + $0xa8] sm:$0xff] }
  0x47   :  { %197 = vmatpush1.bf16.msra.mxu0 %v1498_v19  ;;  %v1349_v52 = vcombine.high %v252_v45, %v256_v46  ;;  %v244_v54 = vld [vmem:[#allocation10] sm:$0xff]  ;;  %v1348_v57 = vcombine.low %v252_v45, %v256_v46  ;;  %v1359_v18 = vcombine.high %v261_v11, %v265_v13  ;;  %v253_v19 = vld [vmem:[#allocation10 + $0x48] sm:$0xff]  ;;  %v1358_v24 = vcombine.low %v261_v11, %v265_v13 }
  0x48   :  { %198 = vmatprep.subr.bf16.mxu0 %v1499_v21  ;;  %1068 = vmatpush1.bf16.msra.mxu1 %v1372_v32  ;;  %v248_v55 = vld [vmem:[#allocation10 + $0x20] sm:$0xff]  ;;  %v257_v21 = vld [vmem:[#allocation10 + $0x68] sm:$0xff] }
  0x49   :  { %1069 = vmatprep.subr.bf16.mxu1 %v1365_v35  ;;  %v1341_v60 = vcombine.high %v244_v54, %v248_v55  ;;  %v364_v62 = vld [vmem:[#allocation10 + $0x3c0] sm:$0xff]  ;;  %v1340_v1 = vcombine.low %v244_v54, %v248_v55  ;;  %v1351_v26 = vcombine.high %v253_v19, %v257_v21  ;;  %v249_v29 = vld [vmem:[#allocation10 + $0x28] sm:$0xff]  ;;  %v1350_v32 = vcombine.low %v253_v19, %v257_v21  ;;  %v306_v19 = vld [vmem:[#allocation10 + $0x1f0] sm:$0xff] }
  0x4a   :  { %v368_v63 = vld [vmem:[#allocation10 + $0x3e0] sm:$0xff]  ;;  %v365_v35 = vld [vmem:[#allocation10 + $0x3c8] sm:$0xff] }
  0x4b   :  { %199 = vmatpush1.bf16.msra.mxu0 %v1501_v25  ;;  %v1461_v4 = vcombine.high %v364_v62, %v368_v63  ;;  %v356_v6 = vld [vmem:[#allocation10 + $0x380] sm:$0xff]  ;;  %v1460_v9 = vcombine.low %v364_v62, %v368_v63  ;;  %v369_v37 = vld [vmem:[#allocation10 + $0x3e8] sm:$0xff] }
  0x4c   :  { %200 = vmatprep.subr.bf16.mxu0 %v1502_v27  ;;  %1070 = vmatpush1.bf16.msra.mxu1 %v1364_v40  ;;  %v360_v7 = vld [vmem:[#allocation10 + $0x3a0] sm:$0xff]  ;;  %v245_v27 = vld [vmem:[#allocation10 + $0x8] sm:$0xff]  ;;  %v1463_v42 = vcombine.high %v365_v35, %v369_v37  ;;  %v1462_v46 = vcombine.low %v365_v35, %v369_v37 }
  0x4d   :  { %1071 = vmatprep.subr.bf16.mxu1 %v1357_v43  ;;  %v1453_v12 = vcombine.high %v356_v6, %v360_v7  ;;  %v348_v14 = vld [vmem:[#allocation10 + $0x340] sm:$0xff]  ;;  %v1452_v17 = vcombine.low %v356_v6, %v360_v7  ;;  %v1343_v34 = vcombine.high %v245_v27, %v249_v29  ;;  %v1342_v40 = vcombine.low %v245_v27, %v249_v29  ;;  %v357_v44 = vld [vmem:[#allocation10 + $0x388] sm:$0xff] }
  0x4e   :  { %v352_v15 = vld [vmem:[#allocation10 + $0x360] sm:$0xff]  ;;  %v361_v45 = vld [vmem:[#allocation10 + $0x3a8] sm:$0xff] }
  0x4f   :  { %201 = vmatpush1.bf16.msra.mxu0 %v1504_v31  ;;  %v1445_v20 = vcombine.high %v348_v14, %v352_v15  ;;  %v340_v22 = vld [vmem:[#allocation10 + $0x300] sm:$0xff]  ;;  %v1444_v25 = vcombine.low %v348_v14, %v352_v15  ;;  %v1454_v51 = vcombine.low %v357_v44, %v361_v45  ;;  %v341_v53 = vld [vmem:[#allocation10 + $0x308] sm:$0xff] }
  0x50   :  { %202 = vmatprep.subr.bf16.mxu0 %v1505_v33  ;;  %1072 = vmatpush1.bf16.msra.mxu1 %v1356_v49  ;;  %v344_v23 = vld [vmem:[#allocation10 + $0x320] sm:$0xff]  ;;  %v349_v49 = vld [vmem:[#allocation10 + $0x348] sm:$0xff] }
  0x51   :  { %1073 = vmatprep.subr.bf16.mxu1 %v1349_v52  ;;  %v1437_v28 = vcombine.high %v340_v22, %v344_v23  ;;  %v332_v30 = vld [vmem:[#allocation10 + $0x2c0] sm:$0xff]  ;;  %v1436_v33 = vcombine.low %v340_v22, %v344_v23  ;;  %v345_v54 = vld [vmem:[#allocation10 + $0x328] sm:$0xff]  ;;  %v307_v22 = vld [vmem:[#allocation10 + $0x1f8] sm:$0xff] }
  0x52   :  { %v336_v31 = vld [vmem:[#allocation10 + $0x2e0] sm:$0xff]  ;;  %v1438_v59 = vcombine.low %v341_v53, %v345_v54  ;;  %v325_v61 = vld [vmem:[#allocation10 + $0x288] sm:$0xff] }
  0x53   :  { %203 = vmatpush1.bf16.msra.mxu0 %v1507_v39  ;;  %v1429_v36 = vcombine.high %v332_v30, %v336_v31  ;;  %v324_v38 = vld [vmem:[#allocation10 + $0x280] sm:$0xff]  ;;  %v329_v62 = vld [vmem:[#allocation10 + $0x2a8] sm:$0xff] }
  0x54   :  { %1102 = vmatprep.subr.bf16.mxu0 %v1399_v41  ;;  %1074 = vmatpush1.bf16.msra.mxu1 %v1348_v57  ;;  %v328_v39 = vld [vmem:[#allocation10 + $0x2a0] sm:$0xff]  ;;  %v1428_v41 = vcombine.low %v332_v30, %v336_v31  ;;  %v333_v57 = vld [vmem:[#allocation10 + $0x2c8] sm:$0xff] }
  0x55   :  { %1075 = vmatprep.subr.bf16.mxu1 %v1341_v60  ;;  %v1421_v43 = vcombine.high %v324_v38, %v328_v39  ;;  %v320_v3 = vld [vmem:[#allocation10 + $0x260] sm:$0xff]  ;;  %v321_v6 = vld [vmem:[#allocation10 + $0x268] sm:$0xff] }
  0x56   :  { %221 = vmatmul.mubr.bf16.vlgmr.msra.gmra.mxu0 %v79_v47  ;;  %v1420_v47 = vcombine.low %v324_v38, %v328_v39  ;;  %v312_v11 = vld [vmem:[#allocation10 + $0x220] sm:$0xff]  ;;  %v313_v14 = vld [vmem:[#allocation10 + $0x228] sm:$0xff] }
  0x57   :  { %1103 = vmatpush1.bf16.msra.mxu0 %v1398_v48  ;;  %v1455_v48 = vcombine.high %v357_v44, %v361_v45  ;;  %v96_v29 = vld [vmem:[%s1735_s2] sm:$0x3]  ;;  %v299_v44 = vld [vmem:[#allocation10 + $0x1b8] sm:$0xff]  ;;  %s1647_s2 = smov [#allocation13]  }
  0x58   :  { %1104 = vmatprep.subr.bf16.mxu0 %v1391_v50  ;;  %1076 = vmatpush1.bf16.msra.mxu1 %v1340_v1  ;;  %v353_v50 = vld [vmem:[#allocation10 + $0x368] sm:$0xff]  ;;  %v1422_v1 = vcombine.low %v325_v61, %v329_v62  ;;  %s1306_s19 = sshll.u32 %s1647_s2, 4  ;;  %s1307_s19 = int_to_ptr.vmem [resolvable:$true] %s1306_s19 }
  0x59   :  { %1077 = vmatprep.subr.bf16.mxu1 %v1461_v4  ;;  %v1447_v52 = vcombine.high %v349_v49, %v353_v50  ;;  %v1446_v55 = vcombine.low %v349_v49, %v353_v50  ;;  %v317_v4 = vld [vmem:[#allocation10 + $0x248] sm:$0xff]  ;;  %v290_v50 = vld [vmem:[#allocation10 + $0x170] sm:$0xff]  ;;  %s1608_s20 = scalar_lea.vmem %s1307_s19, 1024  ;;  %p1613_p7 = scmp.lt.s32.totalorder %s1307_s19, %s1307_s19 }
  0x5a   :  { %v1414_v7 = vcombine.low %v317_v4, %v321_v6  ;;  %p1609_p6 = scmp.ne.s32.totalorder %s1307_s19, %s1608_s20  ;;  %p1614_p8 = scmp.lt.s32.totalorder %s1608_s20, %s1608_s20 }
  0x5b   :  { %1105 = vmatpush1.bf16.msra.mxu0 %v1390_v56  ;;  %v1439_v56 = vcombine.high %v341_v53, %v345_v54 }
  0x5c   :  { %1106 = vmatprep.subr.bf16.mxu0 %v1383_v58  ;;  %1078 = vmatpush2.bf16.msra.mxu1 %v1460_v9  ;;  %v337_v58 = vld [vmem:[#allocation10 + $0x2e8] sm:$0xff]  ;;  %p1615_p9 = por %p1614_p8, %p1613_p7 }
  0x5d   :  { %1079 = vmatprep.subr.bf16.mxu1 %v1453_v12  ;;  %v1431_v60 = vcombine.high %v333_v57, %v337_v58  ;;  %v1430_v63 = vcombine.low %v333_v57, %v337_v58  ;;  %v309_v12 = vld [vmem:[#allocation10 + $0x208] sm:$0xff]  ;;  %v278_v57 = vld [vmem:[#allocation10 + $0x110] sm:$0xff] }
  0x5e   :  { %v1406_v15 = vcombine.low %v309_v12, %v313_v14  ;;  %v282_v58 = vld [vmem:[#allocation10 + $0x130] sm:$0xff]  ;;  %p1616_p10 = pnand %p1615_p9, %p1609_p6 }
  0x5f   :  { %1107 = vmatpush1.bf16.msra.mxu0 %v1382_v0  ;;  %v1423_v0 = vcombine.high %v325_v61, %v329_v62 }
  0x60   :  { %1108 = vmatprep.subr.bf16.mxu0 %v1375_v2  ;;  %1080 = vmatpush2.bf16.msra.mxu1 %v1452_v17  ;;  %v316_v2 = vld [vmem:[#allocation10 + $0x240] sm:$0xff] }
  0x61   :  { %1081 = vmatprep.subr.bf16.mxu1 %v1445_v20  ;;  %v1413_v5 = vcombine.high %v316_v2, %v320_v3  ;;  %v1412_v9 = vcombine.low %v316_v2, %v320_v3  ;;  %v303_v20 = vld [vmem:[#allocation10 + $0x1d8] sm:$0xff]  ;;  %v274_v2 = vld [vmem:[#allocation10 + $0xf0] sm:$0xff] }
  0x62   :  { %v271_v3 = vld [vmem:[#allocation10 + $0xd8] sm:$0xff] }
  0x63   :  { %1109 = vmatpush1.bf16.msra.mxu0 %v1374_v8  ;;  %v1415_v8 = vcombine.high %v317_v4, %v321_v6  ;;  %v275_v4 = vld [vmem:[#allocation10 + $0xf8] sm:$0xff] }
  0x64   :  { %1110 = vmatprep.subr.bf16.mxu0 %v1367_v10  ;;  %1082 = vmatpush2.bf16.msra.mxu1 %v1444_v25  ;;  %v308_v10 = vld [vmem:[#allocation10 + $0x200] sm:$0xff]  ;;  %v1403_v25 = vcombine.high %v303_v20, %v307_v22 }
  0x65   :  { %1083 = vmatprep.subr.bf16.mxu1 %v1437_v28  ;;  %v1405_v13 = vcombine.high %v308_v10, %v312_v11  ;;  %v1404_v17 = vcombine.low %v308_v10, %v312_v11  ;;  %v266_v10 = vld [vmem:[#allocation10 + $0xb0] sm:$0xff]  ;;  %v263_v11 = vld [vmem:[#allocation10 + $0x98] sm:$0xff] }
  0x67   :  { %1111 = vmatpush1.bf16.msra.mxu0 %v1366_v16  ;;  %v1407_v16 = vcombine.high %v309_v12, %v313_v14  ;;  %v267_v12 = vld [vmem:[#allocation10 + $0xb8] sm:$0xff]  ;;  %v1370_v14 = vcombine.low %v271_v3, %v275_v4 }
  0x68   :  { %1112 = vmatprep.subr.bf16.mxu0 %v1359_v18  ;;  %1084 = vmatpush2.bf16.msra.mxu1 %v1436_v33  ;;  %v302_v18 = vld [vmem:[#allocation10 + $0x1d0] sm:$0xff] }
  0x69   :  { %1085 = vmatprep.subr.bf16.mxu1 %v1429_v36  ;;  %v1401_v21 = vcombine.high %v302_v18, %v306_v19  ;;  %v1400_v23 = vcombine.low %v302_v18, %v306_v19  ;;  %v258_v18 = vld [vmem:[#allocation10 + $0x70] sm:$0xff]  ;;  %v255_v19 = vld [vmem:[#allocation10 + $0x58] sm:$0xff] }
  0x6b   :  { %1113 = vmatpush1.bf16.msra.mxu0 %v1358_v24  ;;  %v1402_v24 = vcombine.low %v303_v20, %v307_v22  ;;  %v259_v20 = vld [vmem:[#allocation10 + $0x78] sm:$0xff]  ;;  %v1362_v22 = vcombine.low %v263_v11, %v267_v12 }
  0x6c   :  { %1114 = vmatprep.subr.bf16.mxu0 %v1351_v26  ;;  %1086 = vmatpush2.bf16.msra.mxu1 %v1428_v41  ;;  %v98_v26 = vlaneseq }
  0x6d   :  { %1087 = vmatprep.subr.bf16.mxu1 %v1421_v43  ;;  %v295_v43 = vld [vmem:[#allocation10 + $0x198] sm:$0xff] }
  0x6e   :  { %v1695_v27 = vshrl.u32 %v98_v26, 7  ;;  %v1395_v49 = vcombine.high %v295_v43, %v299_v44  ;;  %v1394_v54 = vcombine.low %v295_v43, %v299_v44  ;;  %v250_v26 = vld [vmem:[#allocation10 + $0x30] sm:$0xff] }
  0x6f   :  { %1115 = vmatpush1.bf16.msra.mxu0 %v1350_v32  ;;  %v358_v44 = vld [vmem:[#allocation10 + $0x390] sm:$0xff] }
  0x70   :  { %1116 = vmatprep.subr.bf16.mxu0 %v1343_v34  ;;  %1088 = vmatpush2.bf16.msra.mxu1 %v1420_v47  ;;  %v100_v28 = vsub.s32 0, %v1695_v27  ;;  %v104_v30 = vsub.s32 1, %v1695_v27  ;;  %v286_v47 = vld [vmem:[#allocation10 + $0x150] sm:$0xff] }
  0x71   :  { %1089 = vmatprep.subr.bf16.mxu1 %v1413_v5  ;;  %v1384_v61 = vcombine.low %v286_v47, %v290_v50  ;;  %v1376_v5 = vcombine.low %v278_v57, %v282_v58 }
  0x72   :  { %v101_v31 = vrot.slane %v96_v29, %v100_v28  ;;  %v105_v32 = vrot.slane %v96_v29, %v104_v30  ;;  %v247_v29 = vld [vmem:[#allocation10 + $0x18] sm:$0xff] }
  0x73   :  { %1117 = vmatpush1.bf16.msra.mxu0 %v1342_v40  ;;  %v294_v40 = vld [vmem:[#allocation10 + $0x190] sm:$0xff] }
  0x74   :  { %1118 = vmatprep.subr.bf16.mxu0 %v1463_v42  ;;  %1090 = vmatpush2.bf16.msra.mxu1 %v1412_v9  ;;  %v298_v42 = vld [vmem:[#allocation10 + $0x1b0] sm:$0xff] }
  0x75   :  { %1091 = vmatprep.subr.bf16.mxu1 %v1405_v13  ;;  %v1392_v53 = vcombine.low %v294_v40, %v298_v42  ;;  %v262_v9 = vld [vmem:[#allocation10 + $0x90] sm:$0xff] }
  0x77   :  { %1119 = vmatpush2.bf16.msra.mxu0 %v1462_v46 }
  0x78   :  { %1120 = vmatprep.subr.bf16.mxu0 %v1455_v48  ;;  %1092 = vmatpush2.bf16.msra.mxu1 %v1404_v17  ;;  %v1393_v48 = vcombine.high %v294_v40, %v298_v42  ;;  %v254_v17 = vld [vmem:[#allocation10 + $0x50] sm:$0xff] }
  0x79   :  { %1143 = vmatprep.subr.bf16.mxu1 %v1401_v21  ;;  %v1360_v21 = vcombine.low %v262_v9, %v266_v10 }
  0x7b   :  { %1121 = vmatpush2.bf16.msra.mxu0 %v1454_v51  ;;  %v287_v51 = vld [vmem:[#allocation10 + $0x158] sm:$0xff] }
  0x7c   :  { %1122 = vmatprep.subr.bf16.mxu0 %v1447_v52  ;;  %v291_v52 = vld [vmem:[#allocation10 + $0x178] sm:$0xff] }
  0x7d   :  { %v1386_v62 = vcombine.low %v287_v51, %v291_v52 }
  0x7f   :  { %1123 = vmatpush2.bf16.msra.mxu0 %v1446_v55  ;;  %v1385_v55 = vcombine.high %v286_v47, %v290_v50  ;;  %v359_v47 = vld [vmem:[#allocation10 + $0x398] sm:$0xff] }
  0x80   :  { %1124 = vmatprep.subr.bf16.mxu0 %v1439_v56  ;;  %v1387_v56 = vcombine.high %v287_v51, %v291_v52 }
  0x83   :  { %1125 = vmatpush2.bf16.msra.mxu0 %v1438_v59  ;;  %v279_v59 = vld [vmem:[#allocation10 + $0x118] sm:$0xff] }
  0x84   :  { %1126 = vmatprep.subr.bf16.mxu0 %v1431_v60  ;;  %v283_v60 = vld [vmem:[#allocation10 + $0x138] sm:$0xff] }
  0x85   :  { %v1378_v6 = vcombine.low %v279_v59, %v283_v60 }
  0x87   :  { %1127 = vmatpush2.bf16.msra.mxu0 %v1430_v63  ;;  %v1377_v63 = vcombine.high %v278_v57, %v282_v58 }
  0x88   :  { %1128 = vmatprep.subr.bf16.mxu0 %v1423_v0  ;;  %v1379_v0 = vcombine.high %v279_v59, %v283_v60 }
  0x8b   :  { %1129 = vmatpush2.bf16.msra.mxu0 %v1422_v1  ;;  %v270_v1 = vld [vmem:[#allocation10 + $0xd0] sm:$0xff] }
  0x8c   :  { %1130 = vmatprep.subr.bf16.mxu0 %v1415_v8  ;;  %v1371_v8 = vcombine.high %v271_v3, %v275_v4  ;;  %v1368_v13 = vcombine.low %v270_v1, %v274_v2 }
  0x8f   :  { %1131 = vmatpush2.bf16.msra.mxu0 %v1414_v7  ;;  %v1369_v7 = vcombine.high %v270_v1, %v274_v2 }
  0x90   :  { %1132 = vmatprep.subr.bf16.mxu0 %v1407_v16  ;;  %v1363_v16 = vcombine.high %v263_v11, %v267_v12 }
  0x93   :  { %1133 = vmatpush2.bf16.msra.mxu0 %v1406_v15  ;;  %v1361_v15 = vcombine.high %v262_v9, %v266_v10 }
  0x94   :  { %1184 = vmatprep.subr.bf16.mxu0 %v1403_v25  ;;  %v246_v25 = vld [vmem:[#allocation10 + $0x10] sm:$0xff] }
  0x95   :  { %v1344_v40 = vcombine.low %v246_v25, %v250_v26 }
 0x116   :  { %v222_v33 = vpop.f32.mrf.mxu0 }
 0x117   :  { %v223_v34 = vadd.f32 %v222_v33, %v101_v31  ;;  %v251_v31 = vld [vmem:[#allocation10 + $0x38] sm:$0xff]  ;;  %v1354_v33 = vcombine.low %v255_v19, %v259_v20 }
 0x118   :  { %v224_v35 = vpop.f32.mrf.mxu0 }
 0x119   :  { %v225_v36 = vadd.f32 %v224_v35, %v105_v32  ;;  %v229_v37 = vmax.f32 %v223_v34, 0.0  ;;  %v1352_v32 = vcombine.low %v254_v17, %v258_v18  ;;  %v1345_v34 = vcombine.high %v246_v25, %v250_v26 }
 0x11a   :  { %v226_v38 = vpop.f32.mrf.mxu0  ;;  %v1347_v35 = vcombine.high %v247_v29, %v251_v31 }
 0x11b   :  { %v230_v39 = vmax.f32 %v225_v36, 0.0  ;;  %v1706_v46 = vpack.c.bf16 %v229_v37, %v229_v37  ;;  %v366_v36 = vld [vmem:[#allocation10 + $0x3d0] sm:$0xff]  ;;  %v367_v38 = vld [vmem:[#allocation10 + $0x3d8] sm:$0xff] }
 0x11c   :  { %v227_v41 = vpop.f32.mrf.mxu0  ;;  %v370_v37 = vld [vmem:[#allocation10 + $0x3f0] sm:$0xff] }
 0x11d   :  { %v1470_v45 = vpack.c.bf16 %v230_v39, %v230_v39  ;;  %v371_v39 = vld [vmem:[#allocation10 + $0x3f8] sm:$0xff]  ;;  %v1346_v41 = vcombine.low %v247_v29, %v251_v31  ;;  %v1465_v42 = vcombine.high %v366_v36, %v370_v37 }
 0x11e   :  { %v1467_v43 = vcombine.high %v367_v38, %v371_v39  ;;  %v1466_v50 = vcombine.low %v367_v38, %v371_v39 }
 0x11f   :  { %1093 = vmatprep.mubr.bf16.mxu1 %v1470_v45  ;;  %1134 = vmatprep.mubr.bf16.mxu0 %v1470_v45 }
 0x120   :  { %1094 = vmatmul.mubr.bf16.vlgmr.msra.gmra.mxu1 %v1706_v46  ;;  %1135 = vmatmul.mubr.bf16.vlgmr.msra.gmra.mxu0 %v1706_v46 }
 0x121   :  { %1144 = vmatpush1.bf16.msra.mxu1 %v1400_v23  ;;  %1185 = vmatpush1.bf16.msra.mxu0 %v1402_v24  ;;  %v1353_v23 = vcombine.high %v254_v17, %v258_v18  ;;  %v1355_v24 = vcombine.high %v255_v19, %v259_v20 }
 0x122   :  { %1175 = vmatprep.mubr.bf16.mxu1 %v1470_v45  ;;  %1216 = vmatprep.mubr.bf16.mxu0 %v1470_v45  ;;  %v362_v45 = vld [vmem:[#allocation10 + $0x3b0] sm:$0xff] }
 0x123   :  { %1145 = vmatprep.subr.bf16.mxu1 %v1393_v48  ;;  %1186 = vmatprep.subr.bf16.mxu0 %v1395_v49  ;;  %v363_v48 = vld [vmem:[#allocation10 + $0x3b8] sm:$0xff]  ;;  %v1464_v49 = vcombine.low %v366_v36, %v370_v37  ;;  %v1457_v51 = vcombine.high %v358_v44, %v362_v45  ;;  %v1456_v57 = vcombine.low %v358_v44, %v362_v45  ;;  %v372_v44 = vld [vmem:[#allocation11] sm:$0xff]  ;;  %v388_v45 = vsub.s32 3, %v1695_v27 }
 0x124   :  { %v1459_v52 = vcombine.high %v359_v47, %v363_v48  ;;  %v1458_v58 = vcombine.low %v359_v47, %v363_v48  ;;  %v377_v47 = vrot.slane %v372_v44, %v100_v28 }
 0x125   :  { %1146 = vmatpush1.bf16.msra.mxu1 %v1392_v53  ;;  %1187 = vmatpush1.bf16.msra.mxu0 %v1394_v54  ;;  %v350_v53 = vld [vmem:[#allocation10 + $0x350] sm:$0xff] }
 0x126   :  { %1147 = vmatprep.subr.bf16.mxu1 %v1385_v55  ;;  %1188 = vmatprep.subr.bf16.mxu0 %v1387_v56  ;;  %v354_v54 = vld [vmem:[#allocation10 + $0x370] sm:$0xff]  ;;  %v351_v55 = vld [vmem:[#allocation10 + $0x358] sm:$0xff] }
 0x127   :  { %v355_v56 = vld [vmem:[#allocation10 + $0x378] sm:$0xff]  ;;  %v1449_v59 = vcombine.high %v350_v53, %v354_v54  ;;  %v1448_v1 = vcombine.low %v350_v53, %v354_v54 }
 0x128   :  { %v1451_v60 = vcombine.high %v351_v55, %v355_v56  ;;  %v1450_v2 = vcombine.low %v351_v55, %v355_v56 }
 0x129   :  { %1148 = vmatpush1.bf16.msra.mxu1 %v1384_v61  ;;  %1189 = vmatpush1.bf16.msra.mxu0 %v1386_v62  ;;  %v342_v61 = vld [vmem:[#allocation10 + $0x310] sm:$0xff] }
 0x12a   :  { %1149 = vmatprep.subr.bf16.mxu1 %v1377_v63  ;;  %1190 = vmatprep.subr.bf16.mxu0 %v1379_v0  ;;  %v346_v62 = vld [vmem:[#allocation10 + $0x330] sm:$0xff]  ;;  %v343_v63 = vld [vmem:[#allocation10 + $0x318] sm:$0xff] }
 0x12b   :  { %v347_v0 = vld [vmem:[#allocation10 + $0x338] sm:$0xff]  ;;  %v1441_v3 = vcombine.high %v342_v61, %v346_v62  ;;  %v1440_v9 = vcombine.low %v342_v61, %v346_v62  ;;  %v392_v61 = vsub.s32 4, %v1695_v27  ;;  %v396_v62 = vsub.s32 5, %v1695_v27 }
 0x12c   :  { %v1443_v4 = vcombine.high %v343_v63, %v347_v0  ;;  %v1442_v10 = vcombine.low %v343_v63, %v347_v0  ;;  %v404_v63 = vsub.s32 7, %v1695_v27 }
 0x12d   :  { %1150 = vmatpush1.bf16.msra.mxu1 %v1376_v5  ;;  %1191 = vmatpush1.bf16.msra.mxu0 %v1378_v6  ;;  %v334_v5 = vld [vmem:[#allocation10 + $0x2d0] sm:$0xff]  ;;  %v393_v0 = vrot.slane %v372_v44, %v392_v61 }
 0x12e   :  { %1151 = vmatprep.subr.bf16.mxu1 %v1369_v7  ;;  %1192 = vmatprep.subr.bf16.mxu0 %v1371_v8  ;;  %v338_v6 = vld [vmem:[#allocation10 + $0x2f0] sm:$0xff]  ;;  %v335_v7 = vld [vmem:[#allocation10 + $0x2d8] sm:$0xff] }
 0x12f   :  { %v339_v8 = vld [vmem:[#allocation10 + $0x2f8] sm:$0xff]  ;;  %v1433_v11 = vcombine.high %v334_v5, %v338_v6  ;;  %v1432_v17 = vcombine.low %v334_v5, %v338_v6 }
 0x130   :  { %v1435_v12 = vcombine.high %v335_v7, %v339_v8  ;;  %v1434_v18 = vcombine.low %v335_v7, %v339_v8 }
 0x131   :  { %1152 = vmatpush1.bf16.msra.mxu1 %v1368_v13  ;;  %1193 = vmatpush1.bf16.msra.mxu0 %v1370_v14  ;;  %v326_v13 = vld [vmem:[#allocation10 + $0x290] sm:$0xff] }
 0x132   :  { %1153 = vmatprep.subr.bf16.mxu1 %v1361_v15  ;;  %1194 = vmatprep.subr.bf16.mxu0 %v1363_v16  ;;  %v330_v14 = vld [vmem:[#allocation10 + $0x2b0] sm:$0xff]  ;;  %v327_v15 = vld [vmem:[#allocation10 + $0x298] sm:$0xff] }
 0x133   :  { %v331_v16 = vld [vmem:[#allocation10 + $0x2b8] sm:$0xff]  ;;  %v1425_v19 = vcombine.high %v326_v13, %v330_v14  ;;  %v1424_v25 = vcombine.low %v326_v13, %v330_v14 }
 0x134   :  { %v1427_v20 = vcombine.high %v327_v15, %v331_v16  ;;  %v1426_v26 = vcombine.low %v327_v15, %v331_v16 }
 0x135   :  { %1154 = vmatpush1.bf16.msra.mxu1 %v1360_v21  ;;  %1195 = vmatpush1.bf16.msra.mxu0 %v1362_v22  ;;  %v318_v21 = vld [vmem:[#allocation10 + $0x250] sm:$0xff] }
 0x136   :  { %1155 = vmatprep.subr.bf16.mxu1 %v1353_v23  ;;  %1196 = vmatprep.subr.bf16.mxu0 %v1355_v24  ;;  %v322_v22 = vld [vmem:[#allocation10 + $0x270] sm:$0xff]  ;;  %v319_v23 = vld [vmem:[#allocation10 + $0x258] sm:$0xff] }
 0x137   :  { %v323_v24 = vld [vmem:[#allocation10 + $0x278] sm:$0xff]  ;;  %v1417_v29 = vcombine.high %v318_v21, %v322_v22  ;;  %v1416_v36 = vcombine.low %v318_v21, %v322_v22  ;;  %v1646_v22 = vmov 0.0  }
 0x138   :  { %v1419_v31 = vcombine.high %v319_v23, %v323_v24  ;;  %v1418_v37 = vcombine.low %v319_v23, %v323_v24  ;;  %242 = vst.msk [vmem:[#allocation4] sm:$0xff] %vm240_vm0, %v1646_v22 }
 0x139   :  { %1156 = vmatpush1.bf16.msra.mxu1 %v1352_v32  ;;  %1197 = vmatpush1.bf16.msra.mxu0 %v1354_v33  ;;  %v310_v32 = vld [vmem:[#allocation10 + $0x210] sm:$0xff] }
 0x13a   :  { %1157 = vmatprep.subr.bf16.mxu1 %v1345_v34  ;;  %1198 = vmatprep.subr.bf16.mxu0 %v1347_v35  ;;  %v314_v33 = vld [vmem:[#allocation10 + $0x230] sm:$0xff]  ;;  %v311_v34 = vld [vmem:[#allocation10 + $0x218] sm:$0xff] }
 0x13b   :  { %v315_v35 = vld [vmem:[#allocation10 + $0x238] sm:$0xff]  ;;  %v1409_v38 = vcombine.high %v310_v32, %v314_v33 }
 0x13c   :  { %v1411_v39 = vcombine.high %v311_v34, %v315_v35 }
 0x13d   :  { %1158 = vmatpush1.bf16.msra.mxu1 %v1344_v40  ;;  %1199 = vmatpush1.bf16.msra.mxu0 %v1346_v41  ;;  %v1408_v40 = vcombine.low %v310_v32, %v314_v33  ;;  %v1410_v41 = vcombine.low %v311_v34, %v315_v35 }
 0x13e   :  { %1159 = vmatprep.subr.bf16.mxu1 %v1465_v42  ;;  %1200 = vmatprep.subr.bf16.mxu0 %v1467_v43  ;;  %v1645_v42 = vmov -inf   ;;  %v384_v43 = vsub.s32 2, %v1695_v27 }
 0x13f   :  { %241 = vst.msk [vmem:[#allocation3] sm:$0xff] %vm240_vm0, %v1645_v42 }
 0x140   :  { %v385_v48 = vrot.slane %v372_v44, %v384_v43 }
 0x141   :  { %1160 = vmatpush2.bf16.msra.mxu1 %v1464_v49  ;;  %1201 = vmatpush2.bf16.msra.mxu0 %v1466_v50  ;;  %v381_v49 = vrot.slane %v372_v44, %v104_v30  ;;  %v389_v50 = vrot.slane %v372_v44, %v388_v45  ;;  %v400_v30 = vsub.s32 6, %v1695_v27 }
 0x142   :  { %1161 = vmatprep.subr.bf16.mxu1 %v1457_v51  ;;  %1202 = vmatprep.subr.bf16.mxu0 %v1459_v52 }
 0x145   :  { %1162 = vmatpush2.bf16.msra.mxu1 %v1456_v57  ;;  %1203 = vmatpush2.bf16.msra.mxu0 %v1458_v58 }
 0x146   :  { %1163 = vmatprep.subr.bf16.mxu1 %v1449_v59  ;;  %1204 = vmatprep.subr.bf16.mxu0 %v1451_v60  ;;  %v1233_v23 = vld [vmem:[#allocation3] sm:$0xff] }
 0x149   :  { %1164 = vmatpush2.bf16.msra.mxu1 %v1448_v1  ;;  %1205 = vmatpush2.bf16.msra.mxu0 %v1450_v2  ;;  %v401_v1 = vrot.slane %v372_v44, %v400_v30  ;;  %v397_v2 = vrot.slane %v372_v44, %v396_v62 }
 0x14a   :  { %1165 = vmatprep.subr.bf16.mxu1 %v1441_v3  ;;  %1206 = vmatprep.subr.bf16.mxu0 %v1443_v4  ;;  %v405_v3 = vrot.slane %v372_v44, %v404_v63 }
 0x14d   :  { %1166 = vmatpush2.bf16.msra.mxu1 %v1440_v9  ;;  %1207 = vmatpush2.bf16.msra.mxu0 %v1442_v10 }
 0x14e   :  { %1167 = vmatprep.subr.bf16.mxu1 %v1433_v11  ;;  %1208 = vmatprep.subr.bf16.mxu0 %v1435_v12 }
 0x151   :  { %1168 = vmatpush2.bf16.msra.mxu1 %v1432_v17  ;;  %1209 = vmatpush2.bf16.msra.mxu0 %v1434_v18 }
 0x152   :  { %1169 = vmatprep.subr.bf16.mxu1 %v1425_v19  ;;  %1210 = vmatprep.subr.bf16.mxu0 %v1427_v20 }
 0x155   :  { %1170 = vmatpush2.bf16.msra.mxu1 %v1424_v25  ;;  %1211 = vmatpush2.bf16.msra.mxu0 %v1426_v26 }
 0x156   :  { %1171 = vmatprep.subr.bf16.mxu1 %v1417_v29  ;;  %1212 = vmatprep.subr.bf16.mxu0 %v1419_v31 }
 0x159   :  { %1172 = vmatpush2.bf16.msra.mxu1 %v1416_v36  ;;  %1213 = vmatpush2.bf16.msra.mxu0 %v1418_v37 }
 0x15a   :  { %1173 = vmatprep.subr.bf16.mxu1 %v1409_v38  ;;  %1214 = vmatprep.subr.bf16.mxu0 %v1411_v39 }
 0x15d   :  { %1174 = vmatpush2.bf16.msra.mxu1 %v1408_v40  ;;  %1215 = vmatpush2.bf16.msra.mxu0 %v1410_v41 }
 0x160   :  { %1176 = vmatmul.mubr.bf16.vlgmr.msra.gmra.mxu1 %v1706_v46  ;;  %1217 = vmatmul.mubr.bf16.vlgmr.msra.gmra.mxu0 %v1706_v46 }
 0x1e0   :  { %v1095_v51 = vpop.f32.mrf.mxu1  ;;  %v1136_v52 = vpop.f32.mrf.mxu0 }
 0x1e1   :  { %v1096_v46 = vadd.f32 %v1095_v51, %v377_v47  ;;  %v1137_v53 = vadd.f32 %v1136_v52, %v385_v48 }
 0x1e2   :  { %v1097_v54 = vpop.f32.mrf.mxu1  ;;  %v1138_v55 = vpop.f32.mrf.mxu0 }
 0x1e3   :  { %1225 = vst [vmem:[#allocation13] sm:$0xff] %v1096_v46  ;;  %1227 = vst [vmem:[#allocation13 + $0x10] sm:$0xff] %v1137_v53  ;;  %v1098_v56 = vadd.f32 %v1097_v54, %v381_v49  ;;  %v1139_v57 = vadd.f32 %v1138_v55, %v389_v50 }
 0x1e4   :  { %v1099_v58 = vpop.f32.mrf.mxu1  ;;  %v1140_v59 = vpop.f32.mrf.mxu0 }
 0x1e5   :  { %1226 = vst [vmem:[#allocation13 + $0x8] sm:$0xff] %v1098_v56  ;;  %1228 = vst [vmem:[#allocation13 + $0x18] sm:$0xff] %v1139_v57 }
 0x1e6   :  { %v1100_v28 = vpop.f32.mrf.mxu1  ;;  %v1141_v60 = vpop.f32.mrf.mxu0 }
 0x220   :  { %v1177_v4 = vpop.f32.mrf.mxu1  ;;  %v1218_v5 = vpop.f32.mrf.mxu0 }
 0x221   :  { %v1178_v6 = vadd.f32 %v1177_v4, %v393_v0  ;;  %v1219_v7 = vadd.f32 %v1218_v5, %v401_v1 }
 0x222   :  { %v1179_v8 = vpop.f32.mrf.mxu1  ;;  %v1220_v9 = vpop.f32.mrf.mxu0 }
 0x223   :  { %1229 = vst [vmem:[#allocation13 + $0x20] sm:$0xff] %v1178_v6  ;;  %1231 = vst [vmem:[#allocation13 + $0x30] sm:$0xff] %v1219_v7  ;;  %v1180_v10 = vadd.f32 %v1179_v8, %v397_v2  ;;  %v1221_v11 = vadd.f32 %v1220_v9, %v405_v3  ;;  %v1234_v14 = vmax.f32 %v1096_v46, %v1178_v6 }
 0x224   :  { %v1181_v12 = vpop.f32.mrf.mxu1  ;;  %v1222_v13 = vpop.f32.mrf.mxu0  ;;  %v1236_v15 = vmax.f32 %v1137_v53, %v1219_v7 }
 0x225   :  { %1230 = vst [vmem:[#allocation13 + $0x28] sm:$0xff] %v1180_v10  ;;  %1232 = vst [vmem:[#allocation13 + $0x38] sm:$0xff] %v1221_v11  ;;  %v1235_v27 = vmax.f32 %v1098_v56, %v1180_v10  ;;  %v1237_v16 = vmax.f32 %v1139_v57, %v1221_v11 }
 0x226   :  { %v1182_v17 = vpop.f32.mrf.mxu1  ;;  %v1223_v18 = vpop.f32.mrf.mxu0 }
 0x227   :  { %v1238_v19 = vmax.f32 %v1234_v14, %v1235_v27  ;;  %v1239_v20 = vmax.f32 %v1236_v15, %v1237_v16 }
 0x229   :  { %v1240_v21 = vmax.f32 %v1238_v19, %v1239_v20 }
 0x22b   :  { %1241 = vmax.xlane.f32.xlu0 %v1240_v21 }
 0x2b4   :  { %v1242_v24 = vpop.xlane.xlu0 %1241 }
 0x2b5   :  { %v1243_v25 = vmax.f32 %v1233_v23, %v1242_v24 }
 0x2b7   :  { %v1245_v26 = vsub.f32 %v1233_v23, %v1243_v25  ;;  %1290 = vst.msk [vmem:[#allocation3] sm:$0xff] %vm240_vm0, %v1243_v25  ;;  %1251 = vperm.xlu0 %1483, %v1243_v25  }
 0x332   :  { %v1252_v29 = vpop.permute.xlu0 %1251 }
 0x333   :  { %v1254_v31 = vsub.f32 %v1096_v46, %v1252_v29  ;;  %v1255_v32 = vsub.f32 %v1098_v56, %v1252_v29  ;;  %v1256_v33 = vsub.f32 %v1137_v53, %v1252_v29  ;;  %v1257_v34 = vsub.f32 %v1139_v57, %v1252_v29 }
 0x334   :  { %v1258_v37 = vsub.f32 %v1178_v6, %v1252_v29  ;;  %v1259_v39 = vsub.f32 %v1180_v10, %v1252_v29  ;;  %v1260_v41 = vsub.f32 %v1219_v7, %v1252_v29  ;;  %v1261_v44 = vsub.f32 %v1221_v11, %v1252_v29 }
 0x335   :  { %v1262_v35 = vmul.f32 1.442695, %v1254_v31  ;;  %v1264_v36 = vmul.f32 1.442695, %v1255_v32  ;;  %v1266_v38 = vmul.f32 1.442695, %v1256_v33 }
 0x336   :  { %v1268_v40 = vmul.f32 1.442695, %v1257_v34  ;;  %v1270_v42 = vmul.f32 1.442695, %v1258_v37  ;;  %v1272_v43 = vmul.f32 1.442695, %v1259_v39 }
 0x337   :  { %1508 = vpow2.f32 %v1262_v35  ;;  %v1274_v45 = vmul.f32 1.442695, %v1260_v41  ;;  %v1276_v47 = vmul.f32 1.442695, %v1261_v44 }
 0x338   :  { %1510 = vpow2.f32 %v1264_v36 }
 0x339   :  { %1512 = vpow2.f32 %v1266_v38 }
 0x33a   :  { %1514 = vpow2.f32 %v1268_v40 }
 0x33b   :  { %1516 = vpow2.f32 %v1270_v42 }
 0x33c   :  { %1518 = vpow2.f32 %v1272_v43 }
 0x33d   :  { %1520 = vpow2.f32 %v1274_v45 }
 0x33e   :  { %1522 = vpow2.f32 %v1276_v47 }
 0x344   :  { %v1509_v48 = vpop.eup %1508 }
 0x345   :  { %v1511_v49 = vpop.eup %1510 }
 0x346   :  { %v1278_v50 = vadd.f32 %v1511_v49, %v1509_v48  ;;  %v1513_v51 = vpop.eup %1512 }
 0x347   :  { %v1515_v46 = vpop.eup %1514 }
 0x348   :  { %v1279_v52 = vadd.f32 %v1513_v51, %v1278_v50  ;;  %v1517_v54 = vpop.eup %1516 }
 0x349   :  { %v1519_v56 = vpop.eup %1518 }
 0x34a   :  { %v1280_v53 = vadd.f32 %v1515_v46, %v1279_v52  ;;  %v1521_v58 = vpop.eup %1520 }
 0x34b   :  { %v1523_v28 = vpop.eup %1522 }
 0x34c   :  { %v1281_v55 = vadd.f32 %v1517_v54, %v1280_v53 }
 0x34e   :  { %v1282_v57 = vadd.f32 %v1519_v56, %v1281_v55 }
 0x350   :  { %v1283_v59 = vadd.f32 %v1521_v58, %v1282_v57 }
 0x352   :  { %v1284_v60 = vadd.f32 %v1523_v28, %v1283_v59 }
 0x354   :  { %1285 = vadd.xlane.f32.xlu1 %v1284_v60 }
 0x355   :  { %1619 = shalt.err (!%p1616_p10)
}
 0x356   :  { %1309 = dma.vmem_to_hbm [thread:$0]  %s1307_s19, 1024, %s1738_s5, [#allocation7]   ;;  %v1246_v61 = vmul.f32 1.442695, %v1245_v26  ;;  %v1244_v62 = vld [vmem:[#allocation4] sm:$0xff]  ;;  %v1294_v5 = vld [vmem:[#allocation3] sm:$0xff] }
 0x358   :  { %1524 = vpow2.f32 %v1246_v61 }
 0x365   :  { %v1525_v30 = vpop.eup %1524 }
 0x366   :  { %v1248_v63 = vmul.f32 %v1525_v30, %v1244_v62 }
 0x3dd   :  { %v1286_v0 = vpop.xlane.xlu1 %1285 }
 0x3de   :  { %v1287_v1 = vadd.f32 %v1286_v0, %v1248_v63 }
 0x3e0   :  { %1289 = vst.msk [vmem:[#allocation4] sm:$0xff] %vm240_vm0, %v1287_v1 }
 0x3e7   :  { %v1295_v2 = vld [vmem:[#allocation4] sm:$0xff] }
 0x3e8   :  { %1526 = vlog2.f32 %v1295_v2 }
 0x3f5   :  { %v1527_v3 = vpop.eup %1526 }
 0x3f6   :  { %v1297_v4 = vmul.f32 0.6931472, %v1527_v3 }
 0x3f8   :  { %v1298_v6 = vadd.f32 %v1297_v4, %v1294_v5 }
 0x3fa   :  { %1299 = vst.msk [vmem:[%s1739_s6] sm:$0xff] %vm240_vm0, %v1298_v6 }
 0x3fb   :  { %1634 = dma.done.wait [#allocation7], 1024  }
 0x3fc   :  { %1635 = vsyncadd [#allocation7], 4294966272 }
 0x3fd   :  { %1317 = vsyncpa [#allocation6], 1 }
 0x3fe   :  { %1318 = vsyncpa [#allocation9], 1 }
 0x3ff   :  { %1319 = vsyncpa [#allocation12], 1 }
 0x400   :  { %1320 = vsyncpa [#allocation7], 1 }

</bundles_post_ra>
